<compile_context>
chip_gen: v7x
topology: tpu7x:2x2x1
jax: 0.10.0
libtpu: 0.0.40
codegen_flags: <defaults>
</compile_context>

<pallas_src>
import functools

import jax
import jax.numpy as jnp
from jax.experimental import pallas as pl
from jax.experimental.pallas import tpu as pltpu

_BN_EPS = 1e-5                    # PyTorch BatchNorm2d default eps
_TILE_M = 512                     # output pixels per conv tile (multiple of 8)
_RESIZE_LANE_MAX = 8192           # max lane width per resize block
_VMEM_LIMIT = 32 * 1024 * 1024    # scoped VMEM limit, safe on v5e/v6e/v7x


def _round_up(v, m):
    return (v + m - 1) // m * m


def _next_pow2(v):
    p = 1
    while p < v:
        p *= 2
    return p


def _row_block(r):
    """Largest row-block that divides r (multiple of 8, capped at _TILE_M)."""
    if r <= _TILE_M:
        return r
    rb = _TILE_M
    while rb >= 8:
        if r % rb == 0:
            return rb
        rb -= 8
    return r


# ---------------------------------------------------------------------------
# Pallas kernels
# ---------------------------------------------------------------------------
def _conv3x3_kernel(x_ref, halo_ref, w_ref, y_ref, *rest, img_w, tm, nk,
                    m_valid, with_stats):
    """3x3/pad-1 conv as 9 shifted (TM, ck)x(ck, Cout) bf16 dots, K-tiled over
    input-channel chunks into an f32 accumulator.  On the last K step the
    bf16 result and (optionally) per-tile BN partial sums are written."""
    if with_stats:
        ssum_ref, ssq_ref, acc_ref = rest
    else:
        (acc_ref,) = rest
    k = pl.program_id(2)

    @pl.when(k == 0)
    def _():
        acc_ref[...] = jnp.zeros_like(acc_ref)

    # Contiguous window of flattened (H-padded) rows covering all 9 tap shifts.
    win = jnp.concatenate([x_ref[0], halo_ref[0]], axis=0)        # (tm+hb, ck)

    row = (jax.lax.broadcasted_iota(jnp.int32, (tm, 1), 0)
           + pl.program_id(1) * tm)                               # output pixel idx
    wpos = row % img_w
    left_ok = wpos != 0
    right_ok = wpos != img_w - 1

    contrib = jnp.zeros(acc_ref.shape, jnp.float32)
    for t in range(9):
        dy, dx = divmod(t, 3)
        off = dy * img_w + dx
        a = win[off:off + tm]
        if dx == 0:        # left tap is the W zero-pad in the first column
            a = jnp.where(left_ok, a, jnp.zeros_like(a))
        elif dx == 2:      # right tap is the W zero-pad in the last column
            a = jnp.where(right_ok, a, jnp.zeros_like(a))
        contrib = contrib + jnp.dot(a, w_ref[t],
                                    preferred_element_type=jnp.float32)
    acc_ref[...] += contrib

    @pl.when(k == nk - 1)
    def _():
        acc = acc_ref[...]
        y_ref[0] = acc.astype(y_ref.dtype)
        if with_stats:
            # Exclude the M-padding rows from the batch statistics.
            valid = (row < m_valid).astype(jnp.float32)
            av = acc * valid
            ssum_ref[0] = jnp.sum(av, axis=0, keepdims=True)
            ssq_ref[0] = jnp.sum(av * av, axis=0, keepdims=True)


def _matmul_kernel(x_ref, w_ref, y_ref, acc_ref, *, nk):
    """K-tiled (TM, ck)x(ck, Cout) matmul with f32 accumulation (1x1 conv)."""
    @pl.when(pl.program_id(1) == 0)
    def _():
        acc_ref[...] = jnp.zeros_like(acc_ref)

    acc_ref[...] += jnp.dot(x_ref[...], w_ref[...],
                            preferred_element_type=jnp.float32)

    @pl.when(pl.program_id(1) == nk - 1)
    def _():
        y_ref[...] = acc_ref[...].astype(y_ref.dtype)


def _resize_rows_kernel(r_ref, x_ref, o_ref):
    """H-pass of the separable bilinear resize: (Lout, Lin) x (Lin, LANE)."""
    o_ref[0] = jnp.dot(r_ref[...], x_ref[0].astype(jnp.float32),
                       preferred_element_type=jnp.float32).astype(o_ref.dtype)


def _resize_w_stats_kernel(r_ref, x_ref, o_ref, ssum_ref, ssq_ref, *, bh):
    """W-pass of the bilinear resize with fused per-channel BN statistics."""
    cp = o_ref.shape[-1]
    ssum = jnp.zeros((1, cp), jnp.float32)
    ssq = jnp.zeros((1, cp), jnp.float32)
    for b in range(bh):
        y = jnp.dot(r_ref[...], x_ref[0, b].astype(jnp.float32),
                    preferred_element_type=jnp.float32)
        o_ref[0, b] = y.astype(o_ref.dtype)
        ssum = ssum + jnp.sum(y, axis=0, keepdims=True)
        ssq = ssq + jnp.sum(y * y, axis=0, keepdims=True)
    ssum_ref[0] = ssum
    ssq_ref[0] = ssq


def _bn_relu_kernel(y_ref, ssum_ref, ssq_ref, g_ref, b_ref, o_ref, *,
                    inv_count, eps):
    """BN pass 2: normalize with training-mode batch stats (biased var) + ReLU."""
    y = y_ref[0].astype(jnp.float32)
    mean = ssum_ref[...] * inv_count
    # NOTE: E[x^2] - mean^2 with a clamp; adequate for decoder activations.
    var = jnp.maximum(ssq_ref[...] * inv_count - mean * mean, 0.0)
    out = (y - mean) * jax.lax.rsqrt(var + eps) * g_ref[...] + b_ref[...]
    o_ref[0] = jnp.maximum(out, 0.0).astype(o_ref.dtype)


# ---------------------------------------------------------------------------
# Wrappers
# ---------------------------------------------------------------------------
def _conv3x3(x, w9, with_stats):
    """3x3/pad-1 conv.  x: (N, H, W, Cin_p) bf16, w9: (9, Cin_p, Cout_p) bf16.
    Returns (y (N, M_pad, Cout_p) bf16, M[, ssum, ssq])."""
    n, h, w_img, cin_p = x.shape
    cout_p = w9.shape[-1]
    m = h * w_img
    hb = max(16, _next_pow2(2 * w_img + 2))      # halo rows covering all taps
    tm = max(_TILE_M, hb)                        # hb | tm (both powers of two)
    m_pad = _round_up(m, tm)
    nt = m_pad // tm
    r_x = m_pad + tm                             # multiple of tm and hb
    lead = 1 + w_img                             # +1 shift + top H-pad row
    ck = 256 if cin_p % 256 == 0 else 128
    nk = cin_p // ck

    # H-padded, spatially flattened input (W boundary handled by masks).
    x_flat = jnp.pad(x.reshape(n, m, cin_p),
                     ((0, 0), (lead, r_x - lead - m), (0, 0)))

    kernel = functools.partial(_conv3x3_kernel, img_w=w_img, tm=tm, nk=nk,
                               m_valid=m, with_stats=with_stats)
    in_specs = [
        pl.BlockSpec((1, tm, ck), lambda b, i, k: (b, i, k)),
        pl.BlockSpec((1, hb, ck), lambda b, i, k: (b, (i + 1) * (tm // hb), k)),
        pl.BlockSpec((9, ck, cout_p), lambda b, i, k: (0, k, 0)),
    ]
    y_shape = jax.ShapeDtypeStruct((n, m_pad, cout_p), jnp.bfloat16)
    y_spec = pl.BlockSpec((1, tm, cout_p), lambda b, i, k: (b, i, 0))
    cparams = pltpu.CompilerParams(
        dimension_semantics=("parallel", "parallel", "arbitrary"),
        vmem_limit_bytes=_VMEM_LIMIT)
    scratch = [pltpu.VMEM((tm, cout_p), jnp.float32)]

    if with_stats:
        stat_shape = jax.ShapeDtypeStruct((n * nt, 1, cout_p), jnp.float32)
        stat_spec = pl.BlockSpec((1, 1, cout_p),
                                 lambda b, i, k: (b * nt + i, 0, 0))
        y, ssum_p, ssq_p = pl.pallas_call(
            kernel,
            out_shape=(y_shape, stat_shape, stat_shape),
            grid=(n, nt, nk),
            in_specs=in_specs,
            out_specs=(y_spec, stat_spec, stat_spec),
            scratch_shapes=scratch,
            compiler_params=cparams,
        )(x_flat, x_flat, w9)
        return y, m, jnp.sum(ssum_p, axis=0), jnp.sum(ssq_p, axis=0)

    y = pl.pallas_call(
        kernel,
        out_shape=y_shape,
        grid=(n, nt, nk),
        in_specs=in_specs,
        out_specs=y_spec,
        scratch_shapes=scratch,
        compiler_params=cparams,
    )(x_flat, x_flat, w9)
    return y, m


def _matmul(x2d, w):
    """K-tiled (M, Cin_p) @ (Cin_p, Cout_p) bf16 matmul -> bf16 (1x1 conv)."""
    m, cin_p = x2d.shape
    cout_p = w.shape[-1]
    tm = min(_TILE_M, _round_up(m, 8))
    m_pad = _round_up(m, tm)
    if m_pad != m:
        x2d = jnp.pad(x2d, ((0, m_pad - m), (0, 0)))
    ck = 256 if cin_p % 256 == 0 else 128
    nk = cin_p // ck
    y = pl.pallas_call(
        functools.partial(_matmul_kernel, nk=nk),
        out_shape=jax.ShapeDtypeStruct((m_pad, cout_p), jnp.bfloat16),
        grid=(m_pad // tm, nk),
        in_specs=[pl.BlockSpec((tm, ck), lambda i, k: (i, k)),
                  pl.BlockSpec((ck, cout_p), lambda i, k: (k, 0))],
        out_specs=pl.BlockSpec((tm, cout_p), lambda i, k: (i, 0)),
        scratch_shapes=[pltpu.VMEM((tm, cout_p), jnp.float32)],
        compiler_params=pltpu.CompilerParams(
            dimension_semantics=("parallel", "arbitrary"),
            vmem_limit_bytes=_VMEM_LIMIT),
    )(x2d, w)
    return y[:m]


def _interp_matrix(in_size, out_size, align_corners):
    """1-D bilinear interpolation matrix (out_size, in_size), torch semantics."""
    d = jnp.arange(out_size, dtype=jnp.float32)
    if align_corners:
        scale = (in_size - 1) / max(out_size - 1, 1)
        src = d * scale
    else:
        scale = in_size / out_size
        src = jnp.maximum((d + 0.5) * scale - 0.5, 0.0)
    lo = jnp.clip(jnp.floor(src).astype(jnp.int32), 0, in_size - 1)
    hi = jnp.minimum(lo + 1, in_size - 1)
    frac = src - lo.astype(jnp.float32)
    rows = jnp.arange(out_size)
    w = jnp.zeros((out_size, in_size), jnp.float32)
    w = w.at[rows, lo].add(1.0 - frac)
    w = w.at[rows, hi].add(frac)
    return w


def _resize_rows(x3d, r):
    """x3d: (B, Lin, LANES) -> (B, Lout, LANES) via r (Lout, Lin)."""
    b, lin, lanes = x3d.shape
    lout = r.shape[0]
    lane = lanes
    if lanes > _RESIZE_LANE_MAX:
        lane = _RESIZE_LANE_MAX
        while lanes % lane != 0:
            lane -= 128
    return pl.pallas_call(
        _resize_rows_kernel,
        out_shape=jax.ShapeDtypeStruct((b, lout, lanes), x3d.dtype),
        grid=(b, lanes // lane),
        in_specs=[pl.BlockSpec((lout, lin), lambda i, j: (0, 0)),
                  pl.BlockSpec((1, lin, lane), lambda i, j: (i, 0, j))],
        out_specs=pl.BlockSpec((1, lout, lane), lambda i, j: (i, 0, j)),
        compiler_params=pltpu.CompilerParams(
            dimension_semantics=("parallel", "parallel")),
    )(r, x3d)


def _resize_w_with_stats(y4d, r, bh):
    """y4d: (N, Hout, Win, Cp) -> (N, Hout, Wout, Cp) + fused BN statistics."""
    n, hout, win, cp = y4d.shape
    wout = r.shape[0]
    ng = (n * hout) // bh
    x = y4d.reshape(ng, bh, win, cp)
    out, ssum, ssq = pl.pallas_call(
        functools.partial(_resize_w_stats_kernel, bh=bh),
        out_shape=(jax.ShapeDtypeStruct((ng, bh, wout, cp), jnp.bfloat16),
                   jax.ShapeDtypeStruct((ng, 1, cp), jnp.float32),
                   jax.ShapeDtypeStruct((ng, 1, cp), jnp.float32)),
        grid=(ng,),
        in_specs=[pl.BlockSpec((wout, win), lambda i: (0, 0)),
                  pl.BlockSpec((1, bh, win, cp), lambda i: (i, 0, 0, 0))],
        out_specs=(pl.BlockSpec((1, bh, wout, cp), lambda i: (i, 0, 0, 0)),
                   pl.BlockSpec((1, 1, cp), lambda i: (i, 0, 0)),
                   pl.BlockSpec((1, 1, cp), lambda i: (i, 0, 0))),
        compiler_params=pltpu.CompilerParams(
            dimension_semantics=("parallel",)),
    )(r, x)
    return (out.reshape(n, hout, wout, cp),
            jnp.sum(ssum, axis=0), jnp.sum(ssq, axis=0))


def _bilinear_resize_with_stats(x, out_h, out_w, align_corners):
    """Separable bilinear resize; W pass also emits per-channel BN stats."""
    n, hin, win, cp = x.shape
    rh = _interp_matrix(hin, out_h, align_corners)
    rw = _interp_matrix(win, out_w, align_corners)
    # H pass (H is already in the contraction slot -> no transposes needed).
    y = _resize_rows(x.reshape(n, hin, win * cp), rh).reshape(n, out_h, win, cp)
    # W pass (Win already in the contraction slot) with fused statistics.
    bh = 8
    while (n * out_h) % bh != 0:
        bh //= 2
    return _resize_w_with_stats(y, rw, bh)


def _bn_relu_apply(y3d, ssum, ssq, gamma, beta, count):
    """y3d: (B, R, Cp) bf16 -> BN(training stats)+ReLU, bf16 out."""
    b, r, cp = y3d.shape
    rb = _row_block(r)
    kernel = functools.partial(_bn_relu_kernel, inv_count=1.0 / count,
                               eps=_BN_EPS)
    return pl.pallas_call(
        kernel,
        out_shape=jax.ShapeDtypeStruct((b, r, cp), jnp.bfloat16),
        grid=(b, r // rb),
        in_specs=[pl.BlockSpec((1, rb, cp), lambda i, j: (i, j, 0)),
                  pl.BlockSpec((1, cp), lambda i, j: (0, 0)),
                  pl.BlockSpec((1, cp), lambda i, j: (0, 0)),
                  pl.BlockSpec((1, cp), lambda i, j: (0, 0)),
                  pl.BlockSpec((1, cp), lambda i, j: (0, 0))],
        out_specs=pl.BlockSpec((1, rb, cp), lambda i, j: (i, j, 0)),
        compiler_params=pltpu.CompilerParams(
            dimension_semantics=("parallel", "parallel")),
    )(y3d, ssum, ssq, gamma, beta)


def conv3x3_bn_relu(x, p):
    """ConvBNReLU (3x3, pad 1, training-mode BN, ReLU).  x: NHWC bf16 padded."""
    n, h, w_img, _ = x.shape
    y, m, ssum, ssq = _conv3x3(x, p["w"], with_stats=True)
    out = _bn_relu_apply(y, ssum, ssq, p["gamma"], p["beta"], count=n * m)
    cout_p = p["w"].shape[-1]
    return out[:, :m, :].reshape(n, h, w_img, cout_p)


def upsampling_forward(p, x, short_cut, align_corners):
    """UpSampling.forward: interpolate -> conv1 -> concat -> double_conv."""
    n, hin, win, cin_p = x.shape
    hs, ws = short_cut.shape[1], short_cut.shape[2]
    c1 = p["conv1"]
    cout_p = c1["w"].shape[-1]
    # (a) 1x1 conv linear part at the low resolution (commutes with resize).
    m0 = n * hin * win
    y = _matmul(x.reshape(m0, cin_p), c1["w"]).reshape(n, hin, win, cout_p)
    # (b) separable bilinear resize; BN stats fused into the W pass.
    y, ssum, ssq = _bilinear_resize_with_stats(y, hs, ws, align_corners)
    # (c) BatchNorm (batch stats over post-resize tensor, as in the original) + ReLU.
    x1 = _bn_relu_apply(y.reshape(n * hs, ws, cout_p), ssum, ssq,
                        c1["gamma"], c1["beta"], count=n * hs * ws)
    x1 = x1.reshape(n, hs, ws, cout_p)
    # (d) concat with shortcut + double conv.
    # TODO(synk): feed dc0 via two K-source BlockSpecs and drop this concat.
    xc = jnp.concatenate([x1, short_cut], axis=-1)
    xc = conv3x3_bn_relu(xc, p["dc0"])
    return conv3x3_bn_relu(xc, p["dc1"])


def _to_nhwc_padded(x_nchw):
    x = jnp.transpose(x_nchw, (0, 2, 3, 1))
    c = x.shape[-1]
    cp = _round_up(c, 128)
    if cp != c:
        x = jnp.pad(x, ((0, 0), (0, 0), (0, 0), (0, cp - c)))
    return x.astype(jnp.bfloat16)


def decoder_forward(params, x_nchw, short_cuts_nchw, align_corners, spixel):
    """Decoder.forward.  Inputs/outputs are NCHW f32 (PyTorch convention)."""
    x = _to_nhwc_padded(x_nchw)
    scs = [_to_nhwc_padded(s) for s in short_cuts_nchw]

    def to_nchw(t, c):
        return jnp.transpose(t[..., :c], (0, 3, 1, 2)).astype(jnp.float32)

    xs_nchw = [x_nchw.astype(jnp.float32)]
    for i in range(len(scs)):
        x = upsampling_forward(params["up"][i], x, scs[-(i + 1)], align_corners)
        xs_nchw.append(to_nchw(x, params["up"][i]["cout"]))

    if spixel:
        p = params["last"]
        n, h, w_img, _ = x.shape
        y, m = _conv3x3(x, p["w"], with_stats=False)
        out = y[:, :m, :].reshape(n, h, w_img, p["w"].shape[-1])
        out = to_nchw(out, p["cout"])
    else:
        out = xs_nchw[-1]
    return out, xs_nchw


# ---------------------------------------------------------------------------
# Deterministic parameter initialization (synthetic weights, lane-padded)
# ---------------------------------------------------------------------------
def _init_conv_bn(key, cin_segments, cout, k):
    """cin_segments: list of (true_channels, padded_channels) in concat order."""
    kw, kg, kb = jax.random.split(key, 3)
    cout_p = _round_up(cout, 128)
    cin_true = sum(t for t, _ in cin_segments)
    fan_in = float(cin_true * k * k)
    w = jax.random.normal(kw, (k * k, cin_true, cout), jnp.float32)
    w = w / jnp.sqrt(fan_in)
    pieces, o = [], 0
    for t, p_ in cin_segments:
        pieces.append(jnp.pad(w[:, o:o + t, :], ((0, 0), (0, p_ - t), (0, 0))))
        o += t
    w = jnp.concatenate(pieces, axis=1) if len(pieces) > 1 else pieces[0]
    w = jnp.pad(w, ((0, 0), (0, 0), (0, cout_p - cout))).astype(jnp.bfloat16)
    if k == 1:
        w = w[0]                                    # (Cin_p, Cout_p)
    gamma = 1.0 + 0.1 * jax.random.normal(kg, (1, cout), jnp.float32)
    beta = 0.1 * jax.random.normal(kb, (1, cout), jnp.float32)
    return {
        "k": k,
        "cout": cout,
        "w": w,
        "gamma": jnp.pad(gamma, ((0, 0), (0, cout_p - cout)),
                         constant_values=1.0),
        "beta": jnp.pad(beta, ((0, 0), (0, cout_p - cout))),
    }


def init_decoder(key, up_channels, spixel):
    params = {"up": []}
    for cin, cout in up_channels:
        key, k1, k2, k3 = jax.random.split(key, 4)
        cin_p = _round_up(cin, 128)
        cout_p = _round_up(cout, 128)
        params["up"].append({
            "cout": cout,
            "conv1": _init_conv_bn(k1, [(cin, cin_p)], cout, 1),
            "dc0": _init_conv_bn(k2, [(cout, cout_p), (cout, cout_p)], cout, 3),
            "dc1": _init_conv_bn(k3, [(cout, cout_p)], cout, 3),
        })
    if spixel:
        key, kl = jax.random.split(key)
        c_last = up_channels[-1][1]
        params["last"] = _init_conv_bn(kl, [(c_last, _round_up(c_last, 128))],
                                       9, 3)
    return params


# ---------------------------------------------------------------------------
if __name__ == "__main__":
    key = jax.random.PRNGKey(0)

    # Scaled-down channel plan (original: [[2048,1024],[1024,512],[512,256],[256,128]])
    up_channels = [[64, 32], [32, 16], [16, 8], [8, 4]]
    align_corners = False
    spixel = True

    k_params, kx, ks0, ks1, ks2, ks3 = jax.random.split(key, 6)
    params = init_decoder(k_params, up_channels, spixel)

    # x: deepest feature map (NCHW); short_cuts ordered shallow -> deep,
    # channels equal each block's out_channels, spatial doubles per level.
    x = jax.random.normal(kx, (2, up_channels[0][0], 2, 2), jnp.float32)
    short_cuts = [
        jax.random.normal(ks0, (2, 4, 32, 32), jnp.float32),
        jax.random.normal(ks1, (2, 8, 16, 16), jnp.float32),
        jax.random.normal(ks2, (2, 16, 8, 8), jnp.float32),
        jax.random.normal(ks3, (2, 32, 4, 4), jnp.float32),
    ]

    out, xs = decoder_forward(params, x, short_cuts,
                              align_corners=align_corners, spixel=spixel)
    jax.block_until_ready(out)
    jax.block_until_ready(xs)
    print("KERNEL_OK")
</pallas_src>

<mosaic_0001>
module attributes {stable_mosaic.version = 11 : i64} {
  func.func @_matmul_kernel(%arg0: i32, %arg1: i32, %arg2: memref<8x128xbf16, #tpu.memory_space<vmem>>, %arg3: memref<128x128xbf16, #tpu.memory_space<vmem>>, %arg4: memref<8x128xbf16, #tpu.memory_space<vmem>>, %arg5: memref<8x128xf32, #tpu.memory_space<vmem>>) attributes {dimension_semantics = [#tpu.dimension_semantics<parallel>, #tpu.dimension_semantics<arbitrary>], iteration_bounds = array<i64: 1, 1>, scalar_prefetch = 0 : i64, scratch_operands = 1 : i64, tpu.core_type = #tpu.core_type<tc>, window_params = [{transform_indices = @transform_0, window_bounds = array<i64: 8, 128>}, {transform_indices = @transform_1, window_bounds = array<i64: 128, 128>}, {transform_indices = @transform_2, window_bounds = array<i64: 8, 128>}]} {
    %c0_i32 = arith.constant 0 : i32
    %0 = arith.cmpi eq, %arg1, %c0_i32 : i32
    %1 = arith.extui %0 : i1 to i32
    %c0_i32_0 = arith.constant 0 : i32
    %2 = arith.cmpi ne, %1, %c0_i32_0 : i32
    scf.if %2 {
      %cst_10 = arith.constant 0.000000e+00 : f32
      %12 = vector.broadcast %cst_10 : f32 to vector<8x128xf32>
      %c0_11 = arith.constant 0 : index
      %c0_12 = arith.constant 0 : index
      %13 = vector.load %arg5[%c0_11, %c0_12] : memref<8x128xf32, #tpu.memory_space<vmem>>, vector<8x128xf32>
      tpu.vector_store %arg5[%c0_11, %c0_12], %12 {strides = array<i32>} : memref<8x128xf32, #tpu.memory_space<vmem>>, vector<8x128xf32>,
    } else {
    }
    %c0 = arith.constant 0 : index
    %c0_1 = arith.constant 0 : index
    %3 = vector.load %arg5[%c0, %c0_1] : memref<8x128xf32, #tpu.memory_space<vmem>>, vector<8x128xf32>
    %c0_2 = arith.constant 0 : index
    %c0_3 = arith.constant 0 : index
    %4 = vector.load %arg2[%c0_2, %c0_3] : memref<8x128xbf16, #tpu.memory_space<vmem>>, vector<8x128xbf16>
    %c0_4 = arith.constant 0 : index
    %c0_5 = arith.constant 0 : index
    %5 = vector.load %arg3[%c0_4, %c0_5] : memref<128x128xbf16, #tpu.memory_space<vmem>>, vector<128x128xbf16>
    %cst = arith.constant dense<0.000000e+00> : vector<8x128xf32>
    %6 = tpu.matmul %4, %5, %cst {dimension_numbers = #tpu.dot_dimension_numbers<[1], [0], [0], [1], [0, 0, 1, 1], [], []>} : vector<8x128xbf16>, vector<128x128xbf16>, vector<8x128xf32> -> vector<8x128xf32>
    %7 = arith.addf %3, %6 : vector<8x128xf32>
    %c0_6 = arith.constant 0 : index
    %c0_7 = arith.constant 0 : index
    %8 = vector.load %arg5[%c0_6, %c0_7] : memref<8x128xf32, #tpu.memory_space<vmem>>, vector<8x128xf32>
    tpu.vector_store %arg5[%c0_6, %c0_7], %7 {strides = array<i32>} : memref<8x128xf32, #tpu.memory_space<vmem>>, vector<8x128xf32>,
    %c0_i32_8 = arith.constant 0 : i32
    %9 = arith.cmpi eq, %arg1, %c0_i32_8 : i32
    %10 = arith.extui %9 : i1 to i32
    %c0_i32_9 = arith.constant 0 : i32
    %11 = arith.cmpi ne, %10, %c0_i32_9 : i32
    scf.if %11 {
      %c0_10 = arith.constant 0 : index
      %c0_11 = arith.constant 0 : index
      %12 = vector.load %arg5[%c0_10, %c0_11] : memref<8x128xf32, #tpu.memory_space<vmem>>, vector<8x128xf32>
      %13 = arith.truncf %12 : vector<8x128xf32> to vector<8x128xbf16>
      %c0_12 = arith.constant 0 : index
      %c0_13 = arith.constant 0 : index
      %14 = vector.load %arg4[%c0_12, %c0_13] : memref<8x128xbf16, #tpu.memory_space<vmem>>, vector<8x128xbf16>
      tpu.vector_store %arg4[%c0_12, %c0_13], %13 {strides = array<i32>} : memref<8x128xbf16, #tpu.memory_space<vmem>>, vector<8x128xbf16>,
    } else {
    }
    return
  }
  func.func @transform_0(%arg0: i32, %arg1: i32) -> (i32, i32) {
    %c0_i32 = arith.constant 0 : i32
    return %arg0, %arg1 : i32, i32
  }
  func.func @transform_1(%arg0: i32, %arg1: i32) -> (i32, i32) {
    %c0_i32 = arith.constant 0 : i32
    %c0_i32_0 = arith.constant 0 : i32
    return %arg1, %c0_i32 : i32, i32
  }
  func.func @transform_2(%arg0: i32, %arg1: i32) -> (i32, i32) {
    %c0_i32 = arith.constant 0 : i32
    %c0_i32_0 = arith.constant 0 : i32
    return %arg0, %c0_i32 : i32, i32
  }
}

</mosaic_0001>

<bundles_post_ra>
// kernel: tpu_custom_call.1
= control target key start
LH: loop header
LB: loop body
LE: loop exit
PB: predicated region body
PF: predicated region fallthrough
CT: control target
= control target key end

     0   :  { %7 = vsyncpa [#allocation4], 0  ;;  %s363_s0 = inlined_call_operand.hbm [shape: bf16[8,128], index: 0, kind: input, shape index: {}]   ;;  %s364_s1 = inlined_call_operand.hbm [shape: bf16[128,128], index: 1, kind: input, shape index: {}]   ;;  %s365_s2 = inlined_call_operand.hbm [shape: bf16[8,128], index: 2, kind: output, shape index: {}]  }
   0x1   :  { %8 = vsyncpa [#allocation7], 0 }
   0x2   :  { %9 = vsyncpa [#allocation5], 0  ;;  %s298_s9 = smov [#allocation3]   ;;  %s299_s11 = smov [#allocation6]  }
   0x3   :  { %s16_s10 = sshll.u32 %s298_s9, 4  ;;  %s25_s12 = sshll.u32 %s299_s11, 4  ;;  %s17_s10 = int_to_ptr.vmem [resolvable:$true] %s16_s10  ;;  %s320_s12 = int_to_ptr.vmem [resolvable:$true] %s25_s12 }
   0x4   :  { %s226_s15 = scalar_lea.hbm %s363_s0, 64 }
   0x5   :  { %p227_p0 = scmp.ne.s32.totalorder %s363_s0, %s226_s15  ;;  %p230_p1 = scmp.lt.u32.totalorder %s226_s15, %s363_s0 }
   0x7   :  { %p232_p2 = pnand %p230_p1, %p227_p0 }
   0x9   :  { %235 = shalt.err (!%p232_p2)
}
   0xa   :  { %s236_s20 = scalar_lea.vmem %s17_s10, 64  ;;  %p241_p4 = scmp.lt.s32.totalorder %s17_s10, %s17_s10 }
   0xb   :  { %p237_p3 = scmp.ne.s32.totalorder %s17_s10, %s236_s20  ;;  %p242_p5 = scmp.lt.s32.totalorder %s236_s20, %s236_s20 }
   0xd   :  { %p243_p6 = por %p242_p5, %p241_p4 }
   0xf   :  { %p244_p7 = pnand %p243_p6, %p237_p3 }
  0x11   :  { %247 = shalt.err (!%p244_p7)
}
  0x12   :  { %19 = dma.hbm_to_vmem [thread:$0]  %s363_s0, 64, %s17_s10, [#allocation4]  }
  0x13   :  { %s248_s25 = scalar_lea.hbm %s364_s1, 1024 }
  0x14   :  { %p249_p8 = scmp.ne.s32.totalorder %s364_s1, %s248_s25  ;;  %p252_p9 = scmp.lt.u32.totalorder %s248_s25, %s364_s1 }
  0x16   :  { %p254_p10 = pnand %p252_p9, %p249_p8 }
  0x18   :  { %257 = shalt.err (!%p254_p10)
}
  0x19   :  { %s258_s30 = scalar_lea.vmem %s320_s12, 1024  ;;  %p263_p12 = scmp.lt.s32.totalorder %s320_s12, %s320_s12 }
  0x1a   :  { %p259_p11 = scmp.ne.s32.totalorder %s320_s12, %s258_s30  ;;  %p264_p13 = scmp.lt.s32.totalorder %s258_s30, %s258_s30 }
  0x1c   :  { %p265_p0 = por %p264_p13, %p263_p12 }
  0x1e   :  { %p266_p1 = pnand %p265_p0, %p259_p11 }
  0x20   :  { %269 = shalt.err (!%p266_p1)
}
  0x21   :  { %s300_s0 = smov 64   ;;  %s301_s3 = smov 4  }
  0x22   :  { %31 = dma.hbm_to_vmem [thread:$0]  %s364_s1, 1024, %s320_s12, [#allocation7], %s300_s0, %s300_s0, %s301_s3  }
  0x23   :  { %292 = dma.done.wait [#allocation4], 64  }
  0x24   :  { %293 = vsyncadd [#allocation4], 4294967232 }
  0x25   :  { %294 = dma.done.wait [#allocation7], 1024  }
  0x26   :  { %295 = vsyncadd [#allocation7], 4294966272  ;;  %v302_v0 = vmov 0.0   ;;  %vm303_vm0 = vmmov 0   ;;  %v218_v1 = vld [vmem:[#allocation6] sm:$0xff]   ;;  %v219_v2 = vld [vmem:[#allocation6 + $0x8] sm:$0xff]  }
  0x27   :  { %191 = vmatprep.subr.bf16.mxu0 %v302_v0  ;;  %207 = vmatprep.mubr.msk.bf16.mxu0 %vm303_vm0, %v302_v0  ;;  %v220_v3 = vld [vmem:[#allocation6 + $0x10] sm:$0xff]   ;;  %v221_v4 = vld [vmem:[#allocation6 + $0x18] sm:$0xff]   ;;  %v222_v5 = vld [vmem:[#allocation6 + $0x20] sm:$0xff]   ;;  %s304_s1 = smov [#allocation8]  }
  0x28   :  { %192 = vmatpush3.bf16.msra.mxu0 %v218_v1  ;;  %v223_v6 = vld [vmem:[#allocation6 + $0x28] sm:$0xff]   ;;  %v224_v7 = vld [vmem:[#allocation6 + $0x30] sm:$0xff]   ;;  %v225_v8 = vld [vmem:[#allocation6 + $0x38] sm:$0xff]   ;;  %s164_s6 = sshll.u32 %s304_s1, 4  ;;  %s165_s6 = int_to_ptr.vmem [resolvable:$true] %s164_s6 }
  0x29   :  { %193 = vmatprep.subr.bf16.mxu0 %v302_v0  ;;  %v45_v9 = vld [vmem:[#allocation3] sm:$0xf]  ;;  %s270_s7 = scalar_lea.vmem %s165_s6, 64  ;;  %p275_p3 = scmp.lt.s32.totalorder %s165_s6, %s165_s6 }
  0x2a   :  { %p271_p2 = scmp.ne.s32.totalorder %s165_s6, %s270_s7  ;;  %p276_p4 = scmp.lt.s32.totalorder %s270_s7, %s270_s7 }
  0x2c   :  { %194 = vmatpush3.bf16.msra.mxu0 %v219_v2  ;;  %p277_p5 = por %p276_p4, %p275_p3 }
  0x2d   :  { %195 = vmatprep.subr.bf16.mxu0 %v302_v0 }
  0x2e   :  { %p278_p6 = pnand %p277_p5, %p271_p2 }
  0x30   :  { %196 = vmatpush3.bf16.msra.mxu0 %v220_v3 }
  0x31   :  { %197 = vmatprep.subr.bf16.mxu0 %v302_v0 }
  0x34   :  { %198 = vmatpush3.bf16.msra.mxu0 %v221_v4 }
  0x35   :  { %199 = vmatprep.subr.bf16.mxu0 %v302_v0 }
  0x38   :  { %200 = vmatpush3.bf16.msra.mxu0 %v222_v5 }
  0x39   :  { %201 = vmatprep.subr.bf16.mxu0 %v302_v0 }
  0x3c   :  { %202 = vmatpush3.bf16.msra.mxu0 %v223_v6 }
  0x3d   :  { %203 = vmatprep.subr.bf16.mxu0 %v302_v0 }
  0x40   :  { %204 = vmatpush3.bf16.msra.mxu0 %v224_v7 }
  0x41   :  { %205 = vmatprep.subr.bf16.mxu0 %v302_v0 }
  0x44   :  { %206 = vmatpush3.bf16.msra.mxu0 %v225_v8 }
  0x47   :  { %208 = vmatmul.mubr.bf16.vlgmr.msra.gmra.mrb[0].mxu0 %v45_v9 }
 0x11a   :  { %v144_v10 = vpop.f32.mrb[0].mxu0 }
 0x11b   :  { %v156_v11 = vpack.c.bf16 %v144_v10, %v144_v10  ;;  %v209_v12 = vpop.f32.mrb[1].mxu0 }
 0x11c   :  { %v147_v13 = vpop.f32.mrb[2].mxu0 }
 0x11d   :  { %157 = vst [vmem:[#allocation8] sm:$0xf] %v156_v11  ;;  %v210_v14 = vpop.f32.mrb[3].mxu0 }
 0x11e   :  { %281 = shalt.err (!%p278_p6)
}
 0x11f   :  { %s282_s10 = scalar_lea.hbm %s365_s2, 64 }
 0x120   :  { %p283_p7 = scmp.ne.s32.totalorder %s365_s2, %s282_s10  ;;  %p286_p8 = scmp.lt.u32.totalorder %s282_s10, %s365_s2 }
 0x122   :  { %p288_p9 = pnand %p286_p8, %p283_p7 }
 0x124   :  { %291 = shalt.err (!%p288_p9)
}
 0x125   :  { %167 = dma.vmem_to_hbm [thread:$0]  %s165_s6, 64, %s365_s2, [#allocation5]  }
 0x126   :  { %296 = dma.done.wait [#allocation5], 64  }
 0x127   :  { %297 = vsyncadd [#allocation5], 4294967232 }
 0x128   :  { %171 = vsyncpa [#allocation4], 1 }
 0x129   :  { %172 = vsyncpa [#allocation7], 1 }
 0x12a   :  { %173 = vsyncpa [#allocation5], 1 }

</bundles_post_ra>
